<compile_context>
chip_gen: v7x
topology: tpu7x:2x2x1
jax: 0.10.0
libtpu: 0.0.40
codegen_flags: <defaults>
</compile_context>

<pallas_src>
import functools

import jax
import jax.numpy as jnp
from jax.experimental import pallas as pl
from jax.experimental.pallas import tpu as pltpu

LANE = 128
SUBLANE = 8
MAX_BLOCK_B = 4096  # VMEM-safe batch tile on v7x (64 MiB phys); v5e/v6e could go higher.


def _round_up(n, m):
    return ((n + m - 1) // m) * m


def _pad2(a, rows, cols):
    return jnp.pad(a, ((0, rows - a.shape[0]), (0, cols - a.shape[1])))


def mlp_kernel(x_ref, w1_ref, b1_ref, w2_ref, b2_ref, w3_ref, b3_ref, o_ref):
    # x arrives as raw f32 (bb, d_in); cast to bf16 on the VPU for the MXU.
    x = x_ref[...].astype(jnp.bfloat16)
    # fc1 + ReLU (bf16 MXU inputs, f32 accumulation, ReLU on the VPU).
    h1 = jnp.dot(x, w1_ref[...], preferred_element_type=jnp.float32)
    h1 = jnp.maximum(h1 + b1_ref[...], 0.0).astype(jnp.bfloat16)
    # fc2 + ReLU.
    h2 = jnp.dot(h1, w2_ref[...], preferred_element_type=jnp.float32)
    h2 = jnp.maximum(h2 + b2_ref[...], 0.0).astype(jnp.bfloat16)
    # fc3 (no activation); lane-dense (bb, 128) bf16 store.
    out = jnp.dot(h2, w3_ref[...], preferred_element_type=jnp.float32)
    o_ref[...] = (out + b3_ref[...]).astype(o_ref.dtype)


def prepare_params(params):
    """One-time pad+cast of weights/biases to an MXU-friendly layout.

    Hidden/output feature dims are zero-padded to multiples of 128 lanes; the padded
    rows/cols/bias lanes are zero, so they never contaminate the real outputs.
    Weights are bf16 (MXU input dtype); biases stay f32.
    """
    w1, b1 = params["fc1"]
    w2, b2 = params["fc2"]
    w3, b3 = params["fc3"]

    d_in, h1 = w1.shape
    h2 = w2.shape[1]
    d_out = w3.shape[1]

    h1_p = _round_up(h1, LANE)
    h2_p = _round_up(h2, LANE)
    d_out_p = _round_up(d_out, LANE)

    return {
        "w1": _pad2(w1, d_in, h1_p).astype(jnp.bfloat16),
        "b1": _pad2(b1.reshape(1, -1), 1, h1_p).astype(jnp.float32),
        "w2": _pad2(w2, h1_p, h2_p).astype(jnp.bfloat16),
        "b2": _pad2(b2.reshape(1, -1), 1, h2_p).astype(jnp.float32),
        "w3": _pad2(w3, h2_p, d_out_p).astype(jnp.bfloat16),
        "b3": _pad2(b3.reshape(1, -1), 1, d_out_p).astype(jnp.float32),
    }


def make_simple_nn_policy(params, *, block_b=2048, out_dtype=jnp.bfloat16):
    """Returns a jitted forward(x) for the given parameters.

    On v7x (2 TensorCores) pick block_b <= round_up(B / 2, 8) for large batches so the
    grid has >= 2 steps and the 'parallel' axis shards across cores; on v5e/v6e the
    single largest tile that fits VMEM is best.
    """
    p = prepare_params(params)  # one-time pad/cast; reused by every forward call
    d_in = params["fc1"][0].shape[0]
    d_out = params["fc3"][0].shape[1]
    h1_p = p["w1"].shape[1]
    h2_p = p["w2"].shape[1]
    d_out_p = p["w3"].shape[1]

    batch_tile = lambda i: (i, 0)  # x / out move with the batch grid index
    resident = lambda i: (0, 0)    # weights & biases stay put across grid steps

    @jax.jit
    def forward(x):
        B = x.shape[0]

        # Batch tiling: multiple of 8 (or the full dim), capped for v7x VMEM.
        bb_cap = max(SUBLANE, min(_round_up(block_b, SUBLANE), MAX_BLOCK_B))
        if B <= bb_cap:
            bb, nb = B, 1                     # one full-batch tile (full dims are legal)
        else:
            nb = pl.cdiv(B, bb_cap)           # balance tiles -> minimal padding
            bb = _round_up(pl.cdiv(B, nb), SUBLANE)
        b_p = nb * bb
        x_in = x if b_p == B else jnp.pad(x, ((0, b_p - B), (0, 0)))

        flops = 2 * b_p * (d_in * h1_p + h1_p * h2_p + h2_p * d_out_p)
        bytes_accessed = (
            b_p * d_in * x.dtype.itemsize
            + (p["w1"].size + p["w2"].size + p["w3"].size) * 2
            + (p["b1"].size + p["b2"].size + p["b3"].size) * 4
            + b_p * d_out_p * jnp.dtype(out_dtype).itemsize
        )

        out_p = pl.pallas_call(
            mlp_kernel,
            out_shape=jax.ShapeDtypeStruct((b_p, d_out_p), out_dtype),
            grid_spec=pltpu.PrefetchScalarGridSpec(
                num_scalar_prefetch=0,
                grid=(nb,),
                in_specs=[
                    pl.BlockSpec((bb, d_in), batch_tile),   # raw f32 x, unpadded lanes
                    pl.BlockSpec((d_in, h1_p), resident),
                    pl.BlockSpec((1, h1_p), resident),
                    pl.BlockSpec((h1_p, h2_p), resident),
                    pl.BlockSpec((1, h2_p), resident),
                    pl.BlockSpec((h2_p, d_out_p), resident),
                    pl.BlockSpec((1, d_out_p), resident),
                ],
                out_specs=pl.BlockSpec((bb, d_out_p), batch_tile),
            ),
            compiler_params=pltpu.CompilerParams(
                dimension_semantics=("parallel",),
                vmem_limit_bytes=32 * 1024 * 1024,
            ),
            cost_estimate=pl.CostEstimate(
                flops=flops, transcendentals=0, bytes_accessed=bytes_accessed
            ),
        )(x_in, p["w1"], p["b1"], p["w2"], p["b2"], p["w3"], p["b3"])

        # Strip row padding (only if any) and the zero output lanes.
        if b_p != B or d_out_p != d_out:
            return out_p[:B, :d_out]
        return out_p

    return forward


def init_linear(key, in_features, out_features):
    """Matches nn.Linear's U(-1/sqrt(fan_in), 1/sqrt(fan_in)) init.
    Returns W of shape (in_features, out_features) and b of shape (1, out_features)."""
    kw, kb = jax.random.split(key)
    bound = 1.0 / jnp.sqrt(jnp.float32(in_features))
    w = jax.random.uniform(kw, (in_features, out_features), jnp.float32, -bound, bound)
    b = jax.random.uniform(kb, (1, out_features), jnp.float32, -bound, bound)
    return w, b


def reference_forward(x, params):
    w1, b1 = params["fc1"]
    w2, b2 = params["fc2"]
    w3, b3 = params["fc3"]
    h = jnp.maximum(x @ w1 + b1, 0.0)
    h = jnp.maximum(h @ w2 + b2, 0.0)
    return h @ w3 + b3


if __name__ == "__main__":
    key = jax.random.PRNGKey(0)
    k_x, k1, k2, k3 = jax.random.split(key, 4)

    input_dim, output_dim = 32, 16
    params = {
        "fc1": init_linear(k1, input_dim, 128),
        "fc2": init_linear(k2, 128, 64),
        "fc3": init_linear(k3, 64, output_dim),
    }

    # Case 1: default large-tile path (whole batch in a single grid step).
    x = jax.random.normal(k_x, (256, input_dim), jnp.float32)
    policy = make_simple_nn_policy(params)  # block_b=2048
    out = jax.block_until_ready(policy(x))
    ref = reference_forward(x, params)      # f32 reference; kernel uses bf16 MXU inputs
    assert out.shape == (256, output_dim)
    err = float(jnp.max(jnp.abs(out.astype(jnp.float32) - ref)))
    assert err < 5e-2, f"case1 max abs err {err}"

    # Case 2: multi-tile path (grid=2; weights stay VMEM-resident across tiles).
    policy_small = make_simple_nn_policy(params, block_b=128)
    out2 = jax.block_until_ready(policy_small(x))
    err2 = float(jnp.max(jnp.abs(out2.astype(jnp.float32) - ref)))
    assert err2 < 5e-2, f"case2 max abs err {err2}"

    # Case 3: batch not divisible by the tile (balanced tiles + minimal row pad).
    x3 = jax.random.normal(k_x, (200, input_dim), jnp.float32)
    out3 = jax.block_until_ready(policy_small(x3))
    ref3 = reference_forward(x3, params)
    assert out3.shape == (200, output_dim)
    err3 = float(jnp.max(jnp.abs(out3.astype(jnp.float32) - ref3)))
    assert err3 < 5e-2, f"case3 max abs err {err3}"

    print("KERNEL_OK")
</pallas_src>

<mosaic_0001>
module attributes {stable_mosaic.version = 11 : i64} {
  func.func @mlp_kernel(%arg0: i32, %arg1: memref<256x32xf32, #tpu.memory_space<vmem>>, %arg2: memref<32x128xbf16, #tpu.memory_space<vmem>>, %arg3: memref<1x128xf32, #tpu.memory_space<vmem>>, %arg4: memref<128x128xbf16, #tpu.memory_space<vmem>>, %arg5: memref<1x128xf32, #tpu.memory_space<vmem>>, %arg6: memref<128x128xbf16, #tpu.memory_space<vmem>>, %arg7: memref<1x128xf32, #tpu.memory_space<vmem>>, %arg8: memref<256x128xbf16, #tpu.memory_space<vmem>>) attributes {dimension_semantics = [#tpu.dimension_semantics<parallel>], iteration_bounds = array<i64: 1>, scalar_prefetch = 0 : i64, scratch_operands = 0 : i64, tpu.core_type = #tpu.core_type<tc>, window_params = [{transform_indices = @transform_0, window_bounds = array<i64: 256, 32>}, {pipeline_mode = #tpu.pipeline_mode<synchronous>, transform_indices = @transform_1, window_bounds = array<i64: 32, 128>}, {pipeline_mode = #tpu.pipeline_mode<synchronous>, transform_indices = @transform_2, window_bounds = array<i64: 1, 128>}, {pipeline_mode = #tpu.pipeline_mode<synchronous>, transform_indices = @transform_3, window_bounds = array<i64: 128, 128>}, {pipeline_mode = #tpu.pipeline_mode<synchronous>, transform_indices = @transform_4, window_bounds = array<i64: 1, 128>}, {pipeline_mode = #tpu.pipeline_mode<synchronous>, transform_indices = @transform_5, window_bounds = array<i64: 128, 128>}, {pipeline_mode = #tpu.pipeline_mode<synchronous>, transform_indices = @transform_6, window_bounds = array<i64: 1, 128>}, {transform_indices = @transform_7, window_bounds = array<i64: 256, 128>}]} {
    %c0 = arith.constant 0 : index
    %c0_0 = arith.constant 0 : index
    %0 = vector.load %arg1[%c0, %c0_0] : memref<256x32xf32, #tpu.memory_space<vmem>>, vector<256x32xf32>
    %1 = arith.truncf %0 : vector<256x32xf32> to vector<256x32xbf16>
    %c0_1 = arith.constant 0 : index
    %c0_2 = arith.constant 0 : index
    %2 = vector.load %arg2[%c0_1, %c0_2] : memref<32x128xbf16, #tpu.memory_space<vmem>>, vector<32x128xbf16>
    %cst = arith.constant dense<0.000000e+00> : vector<256x128xf32>
    %3 = tpu.matmul %1, %2, %cst {dimension_numbers = #tpu.dot_dimension_numbers<[1], [0], [0], [1], [0, 0, 1, 1], [], []>} : vector<256x32xbf16>, vector<32x128xbf16>, vector<256x128xf32> -> vector<256x128xf32>
    %c0_3 = arith.constant 0 : index
    %c0_4 = arith.constant 0 : index
    %4 = vector.load %arg3[%c0_3, %c0_4] : memref<1x128xf32, #tpu.memory_space<vmem>>, vector<1x128xf32>
    %5 = vector.broadcast %4 : vector<1x128xf32> to vector<256x128xf32>
    %6 = arith.addf %3, %5 : vector<256x128xf32>
    %cst_5 = arith.constant 0.000000e+00 : f32
    %7 = vector.broadcast %cst_5 : f32 to vector<256x128xf32>
    %8 = arith.maximumf %6, %7 : vector<256x128xf32>
    %9 = arith.truncf %8 : vector<256x128xf32> to vector<256x128xbf16>
    %c0_6 = arith.constant 0 : index
    %c0_7 = arith.constant 0 : index
    %10 = vector.load %arg4[%c0_6, %c0_7] : memref<128x128xbf16, #tpu.memory_space<vmem>>, vector<128x128xbf16>
    %cst_8 = arith.constant dense<0.000000e+00> : vector<256x128xf32>
    %11 = tpu.matmul %9, %10, %cst_8 {dimension_numbers = #tpu.dot_dimension_numbers<[1], [0], [0], [1], [0, 0, 1, 1], [], []>} : vector<256x128xbf16>, vector<128x128xbf16>, vector<256x128xf32> -> vector<256x128xf32>
    %c0_9 = arith.constant 0 : index
    %c0_10 = arith.constant 0 : index
    %12 = vector.load %arg5[%c0_9, %c0_10] : memref<1x128xf32, #tpu.memory_space<vmem>>, vector<1x128xf32>
    %13 = vector.broadcast %12 : vector<1x128xf32> to vector<256x128xf32>
    %14 = arith.addf %11, %13 : vector<256x128xf32>
    %cst_11 = arith.constant 0.000000e+00 : f32
    %15 = vector.broadcast %cst_11 : f32 to vector<256x128xf32>
    %16 = arith.maximumf %14, %15 : vector<256x128xf32>
    %17 = arith.truncf %16 : vector<256x128xf32> to vector<256x128xbf16>
    %c0_12 = arith.constant 0 : index
    %c0_13 = arith.constant 0 : index
    %18 = vector.load %arg6[%c0_12, %c0_13] : memref<128x128xbf16, #tpu.memory_space<vmem>>, vector<128x128xbf16>
    %cst_14 = arith.constant dense<0.000000e+00> : vector<256x128xf32>
    %19 = tpu.matmul %17, %18, %cst_14 {dimension_numbers = #tpu.dot_dimension_numbers<[1], [0], [0], [1], [0, 0, 1, 1], [], []>} : vector<256x128xbf16>, vector<128x128xbf16>, vector<256x128xf32> -> vector<256x128xf32>
    %c0_15 = arith.constant 0 : index
    %c0_16 = arith.constant 0 : index
    %20 = vector.load %arg7[%c0_15, %c0_16] : memref<1x128xf32, #tpu.memory_space<vmem>>, vector<1x128xf32>
    %21 = vector.broadcast %20 : vector<1x128xf32> to vector<256x128xf32>
    %22 = arith.addf %19, %21 : vector<256x128xf32>
    %23 = arith.truncf %22 : vector<256x128xf32> to vector<256x128xbf16>
    %c0_17 = arith.constant 0 : index
    %c0_18 = arith.constant 0 : index
    %24 = vector.load %arg8[%c0_17, %c0_18] : memref<256x128xbf16, #tpu.memory_space<vmem>>, vector<256x128xbf16>
    tpu.vector_store %arg8[%c0_17, %c0_18], %23 {strides = array<i32>} : memref<256x128xbf16, #tpu.memory_space<vmem>>, vector<256x128xbf16>,
    return
  }
  func.func @transform_0(%arg0: i32) -> (i32, i32) {
    %c0_i32 = arith.constant 0 : i32
    %c0_i32_0 = arith.constant 0 : i32
    return %arg0, %c0_i32 : i32, i32
  }
  func.func @transform_1(%arg0: i32) -> (i32, i32) {
    %c0_i32 = arith.constant 0 : i32
    %c0_i32_0 = arith.constant 0 : i32
    %c0_i32_1 = arith.constant 0 : i32
    return %c0_i32, %c0_i32_0 : i32, i32
  }
  func.func @transform_2(%arg0: i32) -> (i32, i32) {
    %c0_i32 = arith.constant 0 : i32
    %c0_i32_0 = arith.constant 0 : i32
    %c0_i32_1 = arith.constant 0 : i32
    return %c0_i32, %c0_i32_0 : i32, i32
  }
  func.func @transform_3(%arg0: i32) -> (i32, i32) {
    %c0_i32 = arith.constant 0 : i32
    %c0_i32_0 = arith.constant 0 : i32
    %c0_i32_1 = arith.constant 0 : i32
    return %c0_i32, %c0_i32_0 : i32, i32
  }
  func.func @transform_4(%arg0: i32) -> (i32, i32) {
    %c0_i32 = arith.constant 0 : i32
    %c0_i32_0 = arith.constant 0 : i32
    %c0_i32_1 = arith.constant 0 : i32
    return %c0_i32, %c0_i32_0 : i32, i32
  }
  func.func @transform_5(%arg0: i32) -> (i32, i32) {
    %c0_i32 = arith.constant 0 : i32
    %c0_i32_0 = arith.constant 0 : i32
    %c0_i32_1 = arith.constant 0 : i32
    return %c0_i32, %c0_i32_0 : i32, i32
  }
  func.func @transform_6(%arg0: i32) -> (i32, i32) {
    %c0_i32 = arith.constant 0 : i32
    %c0_i32_0 = arith.constant 0 : i32
    %c0_i32_1 = arith.constant 0 : i32
    return %c0_i32, %c0_i32_0 : i32, i32
  }
  func.func @transform_7(%arg0: i32) -> (i32, i32) {
    %c0_i32 = arith.constant 0 : i32
    %c0_i32_0 = arith.constant 0 : i32
    return %arg0, %c0_i32 : i32, i32
  }
}

</mosaic_0001>

<bundles_post_ra>
// kernel: forward.1
= control target key start
LH: loop header
LB: loop body
LE: loop exit
PB: predicated region body
PF: predicated region fallthrough
CT: control target
= control target key end

     0   :  { %vm98_vm0 = vcmask 261120   ;;  %s1822_s1 = inlined_call_operand.vmem [shape: bf16[32,128], index: 1, kind: input, shape index: {}]   ;;  %s1823_s0 = inlined_call_operand.vmem [shape: f32[256,32], index: 0, kind: input, shape index: {}]   ;;  %s1824_s3 = inlined_call_operand.vmem [shape: bf16[128,128], index: 3, kind: input, shape index: {}]   ;;  %s1825_s5 = inlined_call_operand.vmem [shape: bf16[128,128], index: 5, kind: input, shape index: {}]   ;;  %s1826_s2 = inlined_call_operand.vmem [shape: f32[1,128], index: 2, kind: input, shape index: {}]   ;;  %s1827_s4 = inlined_call_operand.vmem [shape: f32[1,128], index: 4, kind: input, shape index: {}]   ;;  %s1828_s6 = inlined_call_operand.vmem [shape: f32[1,128], index: 6, kind: input, shape index: {}]   ;;  %s1829_s7 = inlined_call_operand.vmem [shape: bf16[256,128], index: 7, kind: output, shape index: {}]  }
   0x1   :  { %v1430_v0 = vld [vmem:[%s1822_s1] sm:$0xff]   ;;  %v1431_v1 = vld [vmem:[%s1822_s1 + $0x8] sm:$0xff]   ;;  %v29_v5 = vld [vmem:[%s1823_s0 + $0x10] sm:$0xff] }
   0x2   :  { %1294 = vmatprep.subr.bf16.mxu0 %v1430_v0  ;;  %v27_v2 = vld [vmem:[%s1823_s0] sm:$0xff]  ;;  %v28_v3 = vld [vmem:[%s1823_s0 + $0x8] sm:$0xff]  ;;  %1426 = vmatprep.subr.bf16.mxu1 %v1430_v0  ;;  %v30_v6 = vld [vmem:[%s1823_s0 + $0x18] sm:$0xff] }
   0x3   :  { %1295 = vmatpush3.bf16.msra.mxu0 %v1430_v0  ;;  %v59_v4 = vpack.c.bf16 %v28_v3, %v27_v2  ;;  %1428 = vmatpush3.bf16.msra.mxu1 %v1430_v0  ;;  %v31_v7 = vld [vmem:[%s1823_s0 + $0x20] sm:$0xff]  ;;  %v32_v8 = vld [vmem:[%s1823_s0 + $0x28] sm:$0xff]  ;;  %v60_v9 = vpack.c.bf16 %v30_v6, %v29_v5  ;;  %v45_v14 = vld [vmem:[%s1823_s0 + $0x90] sm:$0xff] }
   0x4   :  { %1296 = vmatprep.subr.bf16.mxu0 %v1431_v1  ;;  %1427 = vmatprep.subr.bf16.mxu1 %v1431_v1  ;;  %v61_v10 = vpack.c.bf16 %v32_v8, %v31_v7  ;;  %v43_v11 = vld [vmem:[%s1823_s0 + $0x80] sm:$0xff]  ;;  %v44_v12 = vld [vmem:[%s1823_s0 + $0x88] sm:$0xff]  ;;  %v46_v15 = vld [vmem:[%s1823_s0 + $0x98] sm:$0xff] }
   0x5   :  { %1298 = vmatprep.mubr.msk.bf16.mxu0 %vm98_vm0, %v59_v4  ;;  %v67_v13 = vpack.c.bf16 %v44_v12, %v43_v11  ;;  %v47_v16 = vld [vmem:[%s1823_s0 + $0xa0] sm:$0xff]  ;;  %v68_v17 = vpack.c.bf16 %v46_v15, %v45_v14  ;;  %v48_v18 = vld [vmem:[%s1823_s0 + $0xa8] sm:$0xff]  ;;  %v33_v19 = vld [vmem:[%s1823_s0 + $0x30] sm:$0xff] }
   0x6   :  { %v34_v20 = vld [vmem:[%s1823_s0 + $0x38] sm:$0xff]  ;;  %v35_v21 = vld [vmem:[%s1823_s0 + $0x40] sm:$0xff]  ;;  %v69_v22 = vpack.c.bf16 %v48_v18, %v47_v16  ;;  %v36_v23 = vld [vmem:[%s1823_s0 + $0x48] sm:$0xff] }
   0x7   :  { %1297 = vmatpush3.bf16.msra.mxu0 %v1431_v1  ;;  %1429 = vmatpush3.bf16.msra.mxu1 %v1431_v1  ;;  %v49_v24 = vld [vmem:[%s1823_s0 + $0xb0] sm:$0xff]  ;;  %v50_v25 = vld [vmem:[%s1823_s0 + $0xb8] sm:$0xff]  ;;  %v51_v26 = vld [vmem:[%s1823_s0 + $0xc0] sm:$0xff]  ;;  %v62_v29 = vpack.c.bf16 %v34_v20, %v33_v19  ;;  %v63_v31 = vpack.c.bf16 %v36_v23, %v35_v21 }
   0x8   :  { %1314 = vmatprep.mubr.msk.bf16.mxu1 %vm98_vm0, %v67_v13  ;;  %v52_v27 = vld [vmem:[%s1823_s0 + $0xc8] sm:$0xff]  ;;  %v1432_v28 = vld [vmem:[%s1824_s3] sm:$0xff]   ;;  %v70_v32 = vpack.c.bf16 %v50_v25, %v49_v24  ;;  %v37_v34 = vld [vmem:[%s1823_s0 + $0x50] sm:$0xff] }
   0x9   :  { %v1433_v30 = vld [vmem:[%s1824_s3 + $0x8] sm:$0xff]   ;;  %1330 = vmatprep.subr.bf16.mxu1 %v1432_v28  ;;  %v71_v33 = vpack.c.bf16 %v52_v27, %v51_v26  ;;  %v38_v35 = vld [vmem:[%s1823_s0 + $0x58] sm:$0xff]  ;;  %v1434_v36 = vld [vmem:[%s1824_s3 + $0x10] sm:$0xff]  }
   0xa   :  { %1299 = vmatmul.mubr.msk.bf16.vlgmr.msra.gmra.mrb[0].mxu0 %vm98_vm0, %v60_v9  ;;  %1315 = vmatmul.mubr.msk.bf16.vlgmr.msra.gmra.mrb[0].mxu1 %vm98_vm0, %v68_v17  ;;  %v39_v37 = vld [vmem:[%s1823_s0 + $0x60] sm:$0xff]  ;;  %v40_v38 = vld [vmem:[%s1823_s0 + $0x68] sm:$0xff]  ;;  %v53_v39 = vld [vmem:[%s1823_s0 + $0xd0] sm:$0xff]  ;;  %v64_v44 = vpack.c.bf16 %v38_v35, %v37_v34 }
   0xb   :  { %1302 = vmatprep.mubr.msk.bf16.mxu0 %vm98_vm0, %v61_v10  ;;  %1318 = vmatprep.mubr.msk.bf16.mxu1 %vm98_vm0, %v69_v22  ;;  %v54_v40 = vld [vmem:[%s1823_s0 + $0xd8] sm:$0xff]  ;;  %v55_v41 = vld [vmem:[%s1823_s0 + $0xe0] sm:$0xff]  ;;  %v56_v42 = vld [vmem:[%s1823_s0 + $0xe8] sm:$0xff]  ;;  %v65_v45 = vpack.c.bf16 %v40_v38, %v39_v37 }
   0xc   :  { %1331 = vmatpush3.bf16.msra.mxu1 %v1432_v28  ;;  %v1435_v43 = vld [vmem:[%s1824_s3 + $0x18] sm:$0xff]   ;;  %v72_v46 = vpack.c.bf16 %v54_v40, %v53_v39  ;;  %v73_v47 = vpack.c.bf16 %v56_v42, %v55_v41  ;;  %v1436_v48 = vld [vmem:[%s1824_s3 + $0x20] sm:$0xff]   ;;  %v41_v49 = vld [vmem:[%s1823_s0 + $0x70] sm:$0xff] }
   0xd   :  { %1332 = vmatprep.subr.bf16.mxu1 %v1433_v30  ;;  %v42_v50 = vld [vmem:[%s1823_s0 + $0x78] sm:$0xff]  ;;  %v57_v51 = vld [vmem:[%s1823_s0 + $0xf0] sm:$0xff]  ;;  %v1437_v53 = vld [vmem:[%s1824_s3 + $0x28] sm:$0xff]  }
   0xe   :  { %v58_v52 = vld [vmem:[%s1823_s0 + $0xf8] sm:$0xff]  ;;  %v66_v54 = vpack.c.bf16 %v42_v50, %v41_v49  ;;  %v1438_v56 = vld [vmem:[%s1824_s3 + $0x30] sm:$0xff]   ;;  %v1440_v58 = vld [vmem:[%s1825_s5] sm:$0xff]  }
   0xf   :  { %v74_v55 = vpack.c.bf16 %v58_v52, %v57_v51  ;;  %v1439_v57 = vld [vmem:[%s1824_s3 + $0x38] sm:$0xff]   ;;  %v1441_v59 = vld [vmem:[%s1825_s5 + $0x8] sm:$0xff]   ;;  %1378 = vmatprep.subr.bf16.mxu0 %v1440_v58  ;;  %v1442_v60 = vld [vmem:[%s1825_s5 + $0x10] sm:$0xff]  }
  0x10   :  { %1333 = vmatpush3.bf16.msra.mxu1 %v1433_v30  ;;  %1379 = vmatpush3.bf16.msra.mxu0 %v1440_v58  ;;  %v1443_v61 = vld [vmem:[%s1825_s5 + $0x18] sm:$0xff]   ;;  %v1444_v62 = vld [vmem:[%s1825_s5 + $0x20] sm:$0xff]   ;;  %v1445_v63 = vld [vmem:[%s1825_s5 + $0x28] sm:$0xff]  }
  0x11   :  { %1334 = vmatprep.subr.bf16.mxu1 %v1434_v36  ;;  %1380 = vmatprep.subr.bf16.mxu0 %v1441_v59  ;;  %v1651_v0 = vld [vmem:[%s1826_s2] ss:$0 sm:$0xff] }
  0x12   :  { %1303 = vmatmul.mubr.msk.bf16.gmra.mrb[4].mxu0 %vm98_vm0, %v62_v29  ;;  %1319 = vmatmul.mubr.msk.bf16.gmra.mrb[4].mxu1 %vm98_vm0, %v70_v32 }
  0x13   :  { %1306 = vmatprep.mubr.msk.bf16.mxu0 %vm98_vm0, %v63_v31  ;;  %1322 = vmatprep.mubr.msk.bf16.mxu1 %vm98_vm0, %v71_v33 }
  0x14   :  { %1335 = vmatpush3.bf16.msra.mxu1 %v1434_v36  ;;  %1381 = vmatpush3.bf16.msra.mxu0 %v1441_v59 }
  0x15   :  { %1336 = vmatprep.subr.bf16.mxu1 %v1435_v43  ;;  %1382 = vmatprep.subr.bf16.mxu0 %v1442_v60 }
  0x18   :  { %1337 = vmatpush3.bf16.msra.mxu1 %v1435_v43  ;;  %1383 = vmatpush3.bf16.msra.mxu0 %v1442_v60 }
  0x19   :  { %1338 = vmatprep.subr.bf16.mxu1 %v1436_v48  ;;  %1384 = vmatprep.subr.bf16.mxu0 %v1443_v61 }
  0x1a   :  { %1307 = vmatmul.mubr.msk.bf16.gmra.mrb[8].mxu0 %vm98_vm0, %v64_v44  ;;  %1323 = vmatmul.mubr.msk.bf16.gmra.mrb[8].mxu1 %vm98_vm0, %v72_v46 }
  0x1b   :  { %1310 = vmatprep.mubr.msk.bf16.mxu0 %vm98_vm0, %v65_v45  ;;  %1326 = vmatprep.mubr.msk.bf16.mxu1 %vm98_vm0, %v73_v47 }
  0x1c   :  { %1339 = vmatpush3.bf16.msra.mxu1 %v1436_v48  ;;  %1385 = vmatpush3.bf16.msra.mxu0 %v1443_v61 }
  0x1d   :  { %1340 = vmatprep.subr.bf16.mxu1 %v1437_v53  ;;  %1386 = vmatprep.subr.bf16.mxu0 %v1444_v62 }
  0x20   :  { %1341 = vmatpush3.bf16.msra.mxu1 %v1437_v53  ;;  %1387 = vmatpush3.bf16.msra.mxu0 %v1444_v62 }
  0x21   :  { %1342 = vmatprep.subr.bf16.mxu1 %v1438_v56  ;;  %1388 = vmatprep.subr.bf16.mxu0 %v1445_v63 }
  0x22   :  { %1311 = vmatmul.mubr.msk.bf16.gmra.mrb[12].mxu0 %vm98_vm0, %v66_v54  ;;  %1327 = vmatmul.mubr.msk.bf16.gmra.mrb[12].mxu1 %vm98_vm0, %v74_v55 }
  0x24   :  { %1343 = vmatpush3.bf16.msra.mxu1 %v1438_v56  ;;  %1389 = vmatpush3.bf16.msra.mxu0 %v1445_v63 }
  0x25   :  { %1344 = vmatprep.subr.bf16.mxu1 %v1439_v57 }
  0x28   :  { %1345 = vmatpush3.bf16.msra.mxu1 %v1439_v57 }
  0xdd   :  { %v1300_v1 = vpop.f32.mrb[0].mxu0  ;;  %v1316_v4 = vpop.f32.mrb[0].mxu1 }
  0xde   :  { %v190_v2 = vadd.f32 %v1300_v1, %v1651_v0  ;;  %v181_v3 = vpop.f32.mrb[1].mxu0  ;;  %v254_v7 = vadd.f32 %v1316_v4, %v1651_v0  ;;  %v245_v8 = vpop.f32.mrb[1].mxu1 }
  0xdf   :  { %v182_v5 = vadd.f32 %v1651_v0, %v181_v3  ;;  %v1301_v6 = vpop.f32.mrb[2].mxu0  ;;  %v246_v11 = vadd.f32 %v1651_v0, %v245_v8  ;;  %v1317_v12 = vpop.f32.mrb[2].mxu1 }
  0xe0   :  { %v193_v9 = vadd.f32 %v1301_v6, %v1651_v0  ;;  %v184_v10 = vpop.f32.mrb[3].mxu0  ;;  %v326_v14 = vmax.f32 %v254_v7, 0.0  ;;  %v257_v15 = vadd.f32 %v1317_v12, %v1651_v0  ;;  %v248_v16 = vpop.f32.mrb[3].mxu1  ;;  %v310_v17 = vmax.f32 %v190_v2, 0.0 }
  0xe1   :  { %v185_v13 = vadd.f32 %v1651_v0, %v184_v10  ;;  %v324_v19 = vmax.f32 %v246_v11, 0.0  ;;  %v249_v20 = vadd.f32 %v1651_v0, %v248_v16  ;;  %v308_v21 = vmax.f32 %v182_v5, 0.0 }
  0xe2   :  { %v311_v18 = vmax.f32 %v193_v9, 0.0  ;;  %v327_v23 = vmax.f32 %v257_v15, 0.0 }
  0xe3   :  { %v309_v22 = vmax.f32 %v185_v13, 0.0  ;;  %v325_v25 = vmax.f32 %v249_v20, 0.0 }
  0xe4   :  { %v341_v24 = vpack.c.bf16 %v311_v18, %v310_v17  ;;  %v1661_v28 = vpack.c.bf16 %v327_v23, %v326_v14 }
  0xe5   :  { %v340_v26 = vpack.c.bf16 %v309_v22, %v308_v21  ;;  %v1304_v27 = vpop.f32.mrb[4].mxu0  ;;  %v1664_v31 = vpack.c.bf16 %v325_v25, %v324_v19  ;;  %v1320_v32 = vpop.f32.mrb[4].mxu1 }
  0xe6   :  { %v206_v29 = vadd.f32 %v1304_v27, %v1651_v0  ;;  %v197_v30 = vpop.f32.mrb[5].mxu0  ;;  %v270_v35 = vadd.f32 %v1320_v32, %v1651_v0  ;;  %v261_v36 = vpop.f32.mrb[5].mxu1 }
  0xe7   :  { %v198_v33 = vadd.f32 %v1651_v0, %v197_v30  ;;  %v1305_v34 = vpop.f32.mrb[6].mxu0  ;;  %1346 = vmatprep.mubr.bf16.mxu1 %v340_v26  ;;  %v262_v39 = vadd.f32 %v1651_v0, %v261_v36  ;;  %v1321_v40 = vpop.f32.mrb[6].mxu1 }
  0xe8   :  { %v209_v37 = vadd.f32 %v1305_v34, %v1651_v0  ;;  %v200_v38 = vpop.f32.mrb[7].mxu0  ;;  %1347 = vmatmul.mubr.bf16.vlgmr.msra.gmra.mrb[16].mxu1 %v341_v24  ;;  %v330_v42 = vmax.f32 %v270_v35, 0.0  ;;  %v273_v43 = vadd.f32 %v1321_v40, %v1651_v0  ;;  %v264_v44 = vpop.f32.mrb[7].mxu1  ;;  %v314_v45 = vmax.f32 %v206_v29, 0.0 }
  0xe9   :  { %v201_v41 = vadd.f32 %v1651_v0, %v200_v38  ;;  %v328_v47 = vmax.f32 %v262_v39, 0.0  ;;  %v265_v48 = vadd.f32 %v1651_v0, %v264_v44  ;;  %v312_v49 = vmax.f32 %v198_v33, 0.0 }
  0xea   :  { %v315_v46 = vmax.f32 %v209_v37, 0.0  ;;  %v331_v51 = vmax.f32 %v273_v43, 0.0 }
  0xeb   :  { %v313_v50 = vmax.f32 %v201_v41, 0.0  ;;  %v329_v53 = vmax.f32 %v265_v48, 0.0 }
  0xec   :  { %v343_v52 = vpack.c.bf16 %v315_v46, %v314_v45  ;;  %v1673_v56 = vpack.c.bf16 %v331_v51, %v330_v42 }
  0xed   :  { %v342_v54 = vpack.c.bf16 %v313_v50, %v312_v49  ;;  %v1308_v55 = vpop.f32.mrb[8].mxu0  ;;  %v350_v59 = vpack.c.bf16 %v329_v53, %v328_v47  ;;  %v1324_v60 = vpop.f32.mrb[8].mxu1 }
  0xee   :  { %v222_v57 = vadd.f32 %v1308_v55, %v1651_v0  ;;  %v213_v58 = vpop.f32.mrb[9].mxu0  ;;  %v286_v63 = vadd.f32 %v1324_v60, %v1651_v0  ;;  %v277_v1 = vpop.f32.mrb[9].mxu1 }
  0xef   :  { %v214_v61 = vadd.f32 %v1651_v0, %v213_v58  ;;  %v1309_v62 = vpop.f32.mrb[10].mxu0  ;;  %1350 = vmatprep.mubr.bf16.mxu1 %v342_v54  ;;  %v278_v4 = vadd.f32 %v1651_v0, %v277_v1  ;;  %v1325_v5 = vpop.f32.mrb[10].mxu1 }
  0xf0   :  { %v225_v2 = vadd.f32 %v1309_v62, %v1651_v0  ;;  %v216_v3 = vpop.f32.mrb[11].mxu0  ;;  %1351 = vmatmul.mubr.bf16.gmra.mrb[20].mxu1 %v343_v52  ;;  %v334_v7 = vmax.f32 %v286_v63, 0.0  ;;  %v289_v8 = vadd.f32 %v1325_v5, %v1651_v0  ;;  %v280_v9 = vpop.f32.mrb[11].mxu1  ;;  %v318_v10 = vmax.f32 %v222_v57, 0.0  ;;  %v1447_v52 = vld [vmem:[%s1825_s5 + $0x38] sm:$0xff]  }
  0xf1   :  { %v217_v6 = vadd.f32 %v1651_v0, %v216_v3  ;;  %v332_v12 = vmax.f32 %v278_v4, 0.0  ;;  %v281_v13 = vadd.f32 %v1651_v0, %v280_v9  ;;  %v316_v14 = vmax.f32 %v214_v61, 0.0 }
  0xf2   :  { %v319_v11 = vmax.f32 %v225_v2, 0.0  ;;  %v335_v16 = vmax.f32 %v289_v8, 0.0 }
  0xf3   :  { %v317_v15 = vmax.f32 %v217_v6, 0.0  ;;  %v333_v18 = vmax.f32 %v281_v13, 0.0 }
  0xf4   :  { %v345_v17 = vpack.c.bf16 %v319_v11, %v318_v10  ;;  %v353_v21 = vpack.c.bf16 %v335_v16, %v334_v7 }
  0xf5   :  { %v344_v19 = vpack.c.bf16 %v317_v15, %v316_v14  ;;  %v1312_v20 = vpop.f32.mrb[12].mxu0  ;;  %v352_v24 = vpack.c.bf16 %v333_v18, %v332_v12  ;;  %v1328_v25 = vpop.f32.mrb[12].mxu1 }
  0xf6   :  { %v238_v22 = vadd.f32 %v1312_v20, %v1651_v0  ;;  %v229_v23 = vpop.f32.mrb[13].mxu0  ;;  %v302_v29 = vadd.f32 %v1328_v25, %v1651_v0  ;;  %v293_v30 = vpop.f32.mrb[13].mxu1 }
  0xf7   :  { %v230_v26 = vadd.f32 %v1651_v0, %v229_v23  ;;  %v1313_v27 = vpop.f32.mrb[14].mxu0  ;;  %1354 = vmatprep.mubr.bf16.mxu1 %v344_v19  ;;  %v294_v34 = vadd.f32 %v1651_v0, %v293_v30  ;;  %v1329_v35 = vpop.f32.mrb[14].mxu1 }
  0xf8   :  { %v241_v32 = vadd.f32 %v1313_v27, %v1651_v0  ;;  %v232_v33 = vpop.f32.mrb[15].mxu0  ;;  %1355 = vmatmul.mubr.bf16.gmra.mrb[24].mxu1 %v345_v17  ;;  %v338_v37 = vmax.f32 %v302_v29, 0.0  ;;  %v305_v38 = vadd.f32 %v1329_v35, %v1651_v0  ;;  %v296_v39 = vpop.f32.mrb[15].mxu1  ;;  %v322_v40 = vmax.f32 %v238_v22, 0.0 }
  0xf9   :  { %v233_v36 = vadd.f32 %v1651_v0, %v232_v33  ;;  %v336_v42 = vmax.f32 %v294_v34, 0.0  ;;  %v297_v43 = vadd.f32 %v1651_v0, %v296_v39  ;;  %v320_v44 = vmax.f32 %v230_v26, 0.0  ;;  %v1446_v0 = vld [vmem:[%s1825_s5 + $0x30] sm:$0xff]  }
  0xfa   :  { %v323_v41 = vmax.f32 %v241_v32, 0.0  ;;  %v339_v46 = vmax.f32 %v305_v38, 0.0  ;;  %1390 = vmatprep.subr.bf16.mxu0 %v1446_v0 }
  0xfb   :  { %v321_v45 = vmax.f32 %v233_v36, 0.0  ;;  %v337_v48 = vmax.f32 %v297_v43, 0.0  ;;  %1391 = vmatpush3.bf16.msra.mxu0 %v1446_v0 }
  0xfc   :  { %v347_v47 = vpack.c.bf16 %v323_v41, %v322_v40  ;;  %v355_v50 = vpack.c.bf16 %v339_v46, %v338_v37  ;;  %1392 = vmatprep.subr.bf16.mxu0 %v1447_v52 }
  0xfd   :  { %v346_v49 = vpack.c.bf16 %v321_v45, %v320_v44  ;;  %v354_v51 = vpack.c.bf16 %v337_v48, %v336_v42 }
  0xff   :  { %1358 = vmatprep.mubr.bf16.mxu1 %v346_v49  ;;  %1393 = vmatpush3.bf16.msra.mxu0 %v1447_v52 }
 0x100   :  { %1359 = vmatmul.mubr.bf16.gmra.mrb[28].mxu1 %v347_v47 }
 0x101   :  { %1362 = vmatprep.mubr.bf16.mxu1 %v1664_v31 }
 0x108   :  { %1363 = vmatmul.mubr.bf16.gmra.mrb[32].mxu1 %v1661_v28  ;;  %v1703_v28 = vld [vmem:[%s1827_s4] ss:$0 sm:$0xff] }
 0x109   :  { %1366 = vmatprep.mubr.bf16.mxu1 %v350_v59 }
 0x110   :  { %1367 = vmatmul.mubr.bf16.gmra.mrb[36].mxu1 %v1673_v56 }
 0x111   :  { %1370 = vmatprep.mubr.bf16.mxu1 %v352_v24 }
 0x118   :  { %1371 = vmatmul.mubr.bf16.gmra.mrb[40].mxu1 %v353_v21 }
 0x119   :  { %1374 = vmatprep.mubr.bf16.mxu1 %v354_v51 }
 0x120   :  { %1375 = vmatmul.mubr.bf16.gmra.mrb[44].mxu1 %v355_v50 }
 0x1bb   :  { %v1348_v31 = vpop.f32.mrb[16].mxu1 }
 0x1bc   :  { %v470_v53 = vadd.f32 %v1348_v31, %v1703_v28  ;;  %v461_v54 = vpop.f32.mrb[17].mxu1 }
 0x1bd   :  { %v462_v55 = vadd.f32 %v1703_v28, %v461_v54  ;;  %v1349_v56 = vpop.f32.mrb[18].mxu1 }
 0x1be   :  { %v473_v57 = vadd.f32 %v1349_v56, %v1703_v28  ;;  %v464_v58 = vpop.f32.mrb[19].mxu1  ;;  %v590_v60 = vmax.f32 %v470_v53, 0.0 }
 0x1bf   :  { %v465_v59 = vadd.f32 %v1703_v28, %v464_v58  ;;  %v588_v62 = vmax.f32 %v462_v55, 0.0 }
 0x1c0   :  { %v591_v61 = vmax.f32 %v473_v57, 0.0 }
 0x1c1   :  { %v589_v63 = vmax.f32 %v465_v59, 0.0 }
 0x1c2   :  { %v621_v1 = vpack.c.bf16 %v591_v61, %v590_v60 }
 0x1c3   :  { %v620_v2 = vpack.c.bf16 %v589_v63, %v588_v62  ;;  %v1352_v3 = vpop.f32.mrb[20].mxu1 }
 0x1c4   :  { %v486_v4 = vadd.f32 %v1352_v3, %v1703_v28  ;;  %v477_v5 = vpop.f32.mrb[21].mxu1 }
 0x1c5   :  { %v478_v6 = vadd.f32 %v1703_v28, %v477_v5  ;;  %v1353_v7 = vpop.f32.mrb[22].mxu1  ;;  %1394 = vmatprep.mubr.bf16.mxu0 %v620_v2 }
 0x1c6   :  { %v489_v8 = vadd.f32 %v1353_v7, %v1703_v28  ;;  %v480_v9 = vpop.f32.mrb[23].mxu1  ;;  %1395 = vmatmul.mubr.bf16.vlgmr.msra.gmra.mrb[16].mxu0 %v621_v1  ;;  %v594_v11 = vmax.f32 %v486_v4, 0.0 }
 0x1c7   :  { %v481_v10 = vadd.f32 %v1703_v28, %v480_v9  ;;  %v592_v13 = vmax.f32 %v478_v6, 0.0 }
 0x1c8   :  { %v595_v12 = vmax.f32 %v489_v8, 0.0 }
 0x1c9   :  { %v593_v14 = vmax.f32 %v481_v10, 0.0 }
 0x1ca   :  { %v623_v15 = vpack.c.bf16 %v595_v12, %v594_v11 }
 0x1cb   :  { %v622_v16 = vpack.c.bf16 %v593_v14, %v592_v13  ;;  %v1356_v17 = vpop.f32.mrb[24].mxu1 }
 0x1cc   :  { %v502_v18 = vadd.f32 %v1356_v17, %v1703_v28  ;;  %v493_v19 = vpop.f32.mrb[25].mxu1 }
 0x1cd   :  { %v494_v20 = vadd.f32 %v1703_v28, %v493_v19  ;;  %v1357_v21 = vpop.f32.mrb[26].mxu1  ;;  %1398 = vmatprep.mubr.bf16.mxu0 %v622_v16 }
 0x1ce   :  { %v505_v22 = vadd.f32 %v1357_v21, %v1703_v28  ;;  %v496_v23 = vpop.f32.mrb[27].mxu1  ;;  %1399 = vmatmul.mubr.bf16.gmra.mrb[20].mxu0 %v623_v15  ;;  %v598_v25 = vmax.f32 %v502_v18, 0.0 }
 0x1cf   :  { %v497_v24 = vadd.f32 %v1703_v28, %v496_v23  ;;  %v596_v27 = vmax.f32 %v494_v20, 0.0 }
 0x1d0   :  { %v599_v26 = vmax.f32 %v505_v22, 0.0 }
 0x1d1   :  { %v597_v29 = vmax.f32 %v497_v24, 0.0 }
 0x1d2   :  { %v625_v30 = vpack.c.bf16 %v599_v26, %v598_v25 }
 0x1d3   :  { %v624_v32 = vpack.c.bf16 %v597_v29, %v596_v27  ;;  %v1360_v33 = vpop.f32.mrb[28].mxu1 }
 0x1d4   :  { %v518_v34 = vadd.f32 %v1360_v33, %v1703_v28  ;;  %v509_v35 = vpop.f32.mrb[29].mxu1 }
 0x1d5   :  { %v510_v36 = vadd.f32 %v1703_v28, %v509_v35  ;;  %v1361_v37 = vpop.f32.mrb[30].mxu1  ;;  %1402 = vmatprep.mubr.bf16.mxu0 %v624_v32 }
 0x1d6   :  { %v521_v38 = vadd.f32 %v1361_v37, %v1703_v28  ;;  %v512_v39 = vpop.f32.mrb[31].mxu1  ;;  %1403 = vmatmul.mubr.bf16.gmra.mrb[24].mxu0 %v625_v30  ;;  %v602_v41 = vmax.f32 %v518_v34, 0.0 }
 0x1d7   :  { %v513_v40 = vadd.f32 %v1703_v28, %v512_v39  ;;  %v600_v43 = vmax.f32 %v510_v36, 0.0 }
 0x1d8   :  { %v603_v42 = vmax.f32 %v521_v38, 0.0 }
 0x1d9   :  { %v601_v44 = vmax.f32 %v513_v40, 0.0 }
 0x1da   :  { %v627_v45 = vpack.c.bf16 %v603_v42, %v602_v41  ;;  %v1740_v41 = vld [vmem:[%s1828_s6] ss:$0 sm:$0xff] }
 0x1db   :  { %v626_v46 = vpack.c.bf16 %v601_v44, %v600_v43  ;;  %v1364_v47 = vpop.f32.mrb[32].mxu1 }
 0x1dc   :  { %v534_v48 = vadd.f32 %v1364_v47, %v1703_v28  ;;  %v525_v49 = vpop.f32.mrb[33].mxu1 }
 0x1dd   :  { %v526_v50 = vadd.f32 %v1703_v28, %v525_v49  ;;  %v1365_v51 = vpop.f32.mrb[34].mxu1  ;;  %1406 = vmatprep.mubr.bf16.mxu0 %v626_v46 }
 0x1de   :  { %v537_v0 = vadd.f32 %v1365_v51, %v1703_v28  ;;  %v528_v52 = vpop.f32.mrb[35].mxu1  ;;  %1407 = vmatmul.mubr.bf16.gmra.mrb[28].mxu0 %v627_v45  ;;  %v606_v53 = vmax.f32 %v534_v48, 0.0 }
 0x1df   :  { %v529_v31 = vadd.f32 %v1703_v28, %v528_v52  ;;  %v604_v55 = vmax.f32 %v526_v50, 0.0 }
 0x1e0   :  { %v607_v54 = vmax.f32 %v537_v0, 0.0 }
 0x1e1   :  { %v605_v56 = vmax.f32 %v529_v31, 0.0 }
 0x1e2   :  { %v629_v57 = vpack.c.bf16 %v607_v54, %v606_v53 }
 0x1e3   :  { %v628_v58 = vpack.c.bf16 %v605_v56, %v604_v55  ;;  %v1368_v59 = vpop.f32.mrb[36].mxu1 }
 0x1e4   :  { %v550_v60 = vadd.f32 %v1368_v59, %v1703_v28  ;;  %v541_v61 = vpop.f32.mrb[37].mxu1 }
 0x1e5   :  { %v542_v62 = vadd.f32 %v1703_v28, %v541_v61  ;;  %v1369_v63 = vpop.f32.mrb[38].mxu1  ;;  %1410 = vmatprep.mubr.bf16.mxu0 %v628_v58 }
 0x1e6   :  { %v553_v1 = vadd.f32 %v1369_v63, %v1703_v28  ;;  %v544_v2 = vpop.f32.mrb[39].mxu1  ;;  %1411 = vmatmul.mubr.bf16.gmra.mrb[32].mxu0 %v629_v57  ;;  %v610_v4 = vmax.f32 %v550_v60, 0.0 }
 0x1e7   :  { %v545_v3 = vadd.f32 %v1703_v28, %v544_v2  ;;  %v608_v6 = vmax.f32 %v542_v62, 0.0 }
 0x1e8   :  { %v611_v5 = vmax.f32 %v553_v1, 0.0 }
 0x1e9   :  { %v609_v7 = vmax.f32 %v545_v3, 0.0 }
 0x1ea   :  { %v631_v8 = vpack.c.bf16 %v611_v5, %v610_v4 }
 0x1eb   :  { %v630_v9 = vpack.c.bf16 %v609_v7, %v608_v6  ;;  %v1372_v10 = vpop.f32.mrb[40].mxu1 }
 0x1ec   :  { %v566_v11 = vadd.f32 %v1372_v10, %v1703_v28  ;;  %v557_v12 = vpop.f32.mrb[41].mxu1 }
 0x1ed   :  { %v558_v13 = vadd.f32 %v1703_v28, %v557_v12  ;;  %v1373_v14 = vpop.f32.mrb[42].mxu1  ;;  %1414 = vmatprep.mubr.bf16.mxu0 %v630_v9 }
 0x1ee   :  { %v569_v15 = vadd.f32 %v1373_v14, %v1703_v28  ;;  %v560_v16 = vpop.f32.mrb[43].mxu1  ;;  %1415 = vmatmul.mubr.bf16.gmra.mrb[36].mxu0 %v631_v8  ;;  %v614_v18 = vmax.f32 %v566_v11, 0.0 }
 0x1ef   :  { %v561_v17 = vadd.f32 %v1703_v28, %v560_v16  ;;  %v612_v20 = vmax.f32 %v558_v13, 0.0 }
 0x1f0   :  { %v615_v19 = vmax.f32 %v569_v15, 0.0 }
 0x1f1   :  { %v613_v21 = vmax.f32 %v561_v17, 0.0 }
 0x1f2   :  { %v633_v22 = vpack.c.bf16 %v615_v19, %v614_v18 }
 0x1f3   :  { %v632_v23 = vpack.c.bf16 %v613_v21, %v612_v20  ;;  %v1376_v24 = vpop.f32.mrb[44].mxu1 }
 0x1f4   :  { %v582_v25 = vadd.f32 %v1376_v24, %v1703_v28  ;;  %v573_v26 = vpop.f32.mrb[45].mxu1 }
 0x1f5   :  { %v574_v27 = vadd.f32 %v1703_v28, %v573_v26  ;;  %v1377_v29 = vpop.f32.mrb[46].mxu1  ;;  %1418 = vmatprep.mubr.bf16.mxu0 %v632_v23 }
 0x1f6   :  { %v585_v30 = vadd.f32 %v1377_v29, %v1703_v28  ;;  %v576_v32 = vpop.f32.mrb[47].mxu1  ;;  %1419 = vmatmul.mubr.bf16.gmra.mrb[40].mxu0 %v633_v22  ;;  %v618_v34 = vmax.f32 %v582_v25, 0.0 }
 0x1f7   :  { %v577_v33 = vadd.f32 %v1703_v28, %v576_v32  ;;  %v616_v36 = vmax.f32 %v574_v27, 0.0 }
 0x1f8   :  { %v619_v35 = vmax.f32 %v585_v30, 0.0 }
 0x1f9   :  { %v617_v37 = vmax.f32 %v577_v33, 0.0 }
 0x1fa   :  { %v635_v38 = vpack.c.bf16 %v619_v35, %v618_v34 }
 0x1fb   :  { %v634_v39 = vpack.c.bf16 %v617_v37, %v616_v36 }
 0x1fd   :  { %1422 = vmatprep.mubr.bf16.mxu0 %v634_v39 }
 0x1fe   :  { %1423 = vmatmul.mubr.bf16.gmra.mrb[44].mxu0 %v635_v38 }
 0x299   :  { %v1396_v40 = vpop.f32.mrb[16].mxu0 }
 0x29a   :  { %v741_v42 = vpop.f32.mrb[17].mxu0  ;;  %v750_v44 = vadd.f32 %v1396_v40, %v1740_v41 }
 0x29b   :  { %v1397_v43 = vpop.f32.mrb[18].mxu0  ;;  %v742_v46 = vadd.f32 %v1740_v41, %v741_v42 }
 0x29c   :  { %v753_v28 = vadd.f32 %v1397_v43, %v1740_v41  ;;  %v744_v45 = vpop.f32.mrb[19].mxu0 }
 0x29d   :  { %v745_v47 = vadd.f32 %v1740_v41, %v744_v45 }
 0x29e   :  { %v1141_v48 = vpack.c.bf16 %v753_v28, %v750_v44 }
 0x29f   :  { %v1136_v49 = vpack.c.bf16 %v745_v47, %v742_v46 }
 0x2a0   :  { %1213 = vst [vmem:[%s1829_s7 + $0x8] sm:$0xff] %v1141_v48  }
 0x2a1   :  { %1137 = vst [vmem:[%s1829_s7] sm:$0xff] %v1136_v49   ;;  %v1400_v50 = vpop.f32.mrb[20].mxu0 }
 0x2a2   :  { %v757_v51 = vpop.f32.mrb[21].mxu0  ;;  %v766_v52 = vadd.f32 %v1400_v50, %v1740_v41 }
 0x2a3   :  { %v1401_v0 = vpop.f32.mrb[22].mxu0  ;;  %v758_v54 = vadd.f32 %v1740_v41, %v757_v51 }
 0x2a4   :  { %v769_v31 = vadd.f32 %v1401_v0, %v1740_v41  ;;  %v760_v53 = vpop.f32.mrb[23].mxu0 }
 0x2a5   :  { %v761_v55 = vadd.f32 %v1740_v41, %v760_v53 }
 0x2a6   :  { %v1151_v56 = vpack.c.bf16 %v769_v31, %v766_v52 }
 0x2a7   :  { %v1146_v57 = vpack.c.bf16 %v761_v55, %v758_v54 }
 0x2a8   :  { %1215 = vst [vmem:[%s1829_s7 + $0x18] sm:$0xff] %v1151_v56  }
 0x2a9   :  { %1214 = vst [vmem:[%s1829_s7 + $0x10] sm:$0xff] %v1146_v57   ;;  %v1404_v58 = vpop.f32.mrb[24].mxu0 }
 0x2aa   :  { %v773_v59 = vpop.f32.mrb[25].mxu0  ;;  %v782_v61 = vadd.f32 %v1404_v58, %v1740_v41 }
 0x2ab   :  { %v1405_v60 = vpop.f32.mrb[26].mxu0  ;;  %v774_v1 = vadd.f32 %v1740_v41, %v773_v59 }
 0x2ac   :  { %v785_v62 = vadd.f32 %v1405_v60, %v1740_v41  ;;  %v776_v63 = vpop.f32.mrb[27].mxu0 }
 0x2ad   :  { %v777_v2 = vadd.f32 %v1740_v41, %v776_v63 }
 0x2ae   :  { %v1161_v3 = vpack.c.bf16 %v785_v62, %v782_v61 }
 0x2af   :  { %v1156_v4 = vpack.c.bf16 %v777_v2, %v774_v1 }
 0x2b0   :  { %1217 = vst [vmem:[%s1829_s7 + $0x28] sm:$0xff] %v1161_v3  }
 0x2b1   :  { %1216 = vst [vmem:[%s1829_s7 + $0x20] sm:$0xff] %v1156_v4   ;;  %v1408_v5 = vpop.f32.mrb[28].mxu0 }
 0x2b2   :  { %v789_v6 = vpop.f32.mrb[29].mxu0  ;;  %v798_v8 = vadd.f32 %v1408_v5, %v1740_v41 }
 0x2b3   :  { %v1409_v7 = vpop.f32.mrb[30].mxu0  ;;  %v790_v11 = vadd.f32 %v1740_v41, %v789_v6 }
 0x2b4   :  { %v801_v9 = vadd.f32 %v1409_v7, %v1740_v41  ;;  %v792_v10 = vpop.f32.mrb[31].mxu0 }
 0x2b5   :  { %v793_v12 = vadd.f32 %v1740_v41, %v792_v10 }
 0x2b6   :  { %v1171_v13 = vpack.c.bf16 %v801_v9, %v798_v8 }
 0x2b7   :  { %v1166_v14 = vpack.c.bf16 %v793_v12, %v790_v11 }
 0x2b8   :  { %1219 = vst [vmem:[%s1829_s7 + $0x38] sm:$0xff] %v1171_v13  }
 0x2b9   :  { %1218 = vst [vmem:[%s1829_s7 + $0x30] sm:$0xff] %v1166_v14   ;;  %v1412_v15 = vpop.f32.mrb[32].mxu0 }
 0x2ba   :  { %v805_v16 = vpop.f32.mrb[33].mxu0  ;;  %v814_v18 = vadd.f32 %v1412_v15, %v1740_v41 }
 0x2bb   :  { %v1413_v17 = vpop.f32.mrb[34].mxu0  ;;  %v806_v21 = vadd.f32 %v1740_v41, %v805_v16 }
 0x2bc   :  { %v817_v19 = vadd.f32 %v1413_v17, %v1740_v41  ;;  %v808_v20 = vpop.f32.mrb[35].mxu0 }
 0x2bd   :  { %v809_v22 = vadd.f32 %v1740_v41, %v808_v20 }
 0x2be   :  { %v1181_v23 = vpack.c.bf16 %v817_v19, %v814_v18 }
 0x2bf   :  { %v1176_v24 = vpack.c.bf16 %v809_v22, %v806_v21 }
 0x2c0   :  { %1221 = vst [vmem:[%s1829_s7 + $0x48] sm:$0xff] %v1181_v23  }
 0x2c1   :  { %1220 = vst [vmem:[%s1829_s7 + $0x40] sm:$0xff] %v1176_v24   ;;  %v1416_v25 = vpop.f32.mrb[36].mxu0 }
 0x2c2   :  { %v821_v26 = vpop.f32.mrb[37].mxu0  ;;  %v830_v29 = vadd.f32 %v1416_v25, %v1740_v41 }
 0x2c3   :  { %v1417_v27 = vpop.f32.mrb[38].mxu0  ;;  %v822_v33 = vadd.f32 %v1740_v41, %v821_v26 }
 0x2c4   :  { %v833_v30 = vadd.f32 %v1417_v27, %v1740_v41  ;;  %v824_v32 = vpop.f32.mrb[39].mxu0 }
 0x2c5   :  { %v825_v34 = vadd.f32 %v1740_v41, %v824_v32 }
 0x2c6   :  { %v1191_v35 = vpack.c.bf16 %v833_v30, %v830_v29 }
 0x2c7   :  { %v1186_v36 = vpack.c.bf16 %v825_v34, %v822_v33 }
 0x2c8   :  { %1223 = vst [vmem:[%s1829_s7 + $0x58] sm:$0xff] %v1191_v35  }
 0x2c9   :  { %1222 = vst [vmem:[%s1829_s7 + $0x50] sm:$0xff] %v1186_v36   ;;  %v1420_v37 = vpop.f32.mrb[40].mxu0 }
 0x2ca   :  { %v837_v38 = vpop.f32.mrb[41].mxu0  ;;  %v846_v40 = vadd.f32 %v1420_v37, %v1740_v41 }
 0x2cb   :  { %v1421_v39 = vpop.f32.mrb[42].mxu0  ;;  %v838_v44 = vadd.f32 %v1740_v41, %v837_v38 }
 0x2cc   :  { %v849_v42 = vadd.f32 %v1421_v39, %v1740_v41  ;;  %v840_v43 = vpop.f32.mrb[43].mxu0 }
 0x2cd   :  { %v841_v28 = vadd.f32 %v1740_v41, %v840_v43 }
 0x2ce   :  { %v1201_v45 = vpack.c.bf16 %v849_v42, %v846_v40 }
 0x2cf   :  { %v1196_v46 = vpack.c.bf16 %v841_v28, %v838_v44 }
 0x2d0   :  { %1225 = vst [vmem:[%s1829_s7 + $0x68] sm:$0xff] %v1201_v45  }
 0x2d1   :  { %1224 = vst [vmem:[%s1829_s7 + $0x60] sm:$0xff] %v1196_v46   ;;  %v1424_v47 = vpop.f32.mrb[44].mxu0 }
 0x2d2   :  { %v853_v48 = vpop.f32.mrb[45].mxu0  ;;  %v862_v50 = vadd.f32 %v1424_v47, %v1740_v41 }
 0x2d3   :  { %v1425_v49 = vpop.f32.mrb[46].mxu0  ;;  %v854_v52 = vadd.f32 %v1740_v41, %v853_v48 }
 0x2d4   :  { %v865_v51 = vadd.f32 %v1425_v49, %v1740_v41  ;;  %v856_v0 = vpop.f32.mrb[47].mxu0 }
 0x2d5   :  { %v857_v31 = vadd.f32 %v1740_v41, %v856_v0 }
 0x2d6   :  { %v1211_v53 = vpack.c.bf16 %v865_v51, %v862_v50 }
 0x2d7   :  { %v1206_v54 = vpack.c.bf16 %v857_v31, %v854_v52 }
 0x2d8   :  { %1227 = vst [vmem:[%s1829_s7 + $0x78] sm:$0xff] %v1211_v53  }
 0x2d9   :  { %1226 = vst [vmem:[%s1829_s7 + $0x70] sm:$0xff] %v1206_v54  }

</bundles_post_ra>
